<compile_context>
chip_gen: v5e
topology: v5e:2x2
jax: 0.10.0
libtpu: 0.0.40
codegen_flags: <defaults>
</compile_context>

<pallas_src>
import jax
import jax.numpy as jnp
from jax.experimental import pallas as pl
from jax.experimental.pallas import tpu as pltpu


def _round_up(n, m):
    return (n + m - 1) // m * m


def net_kernel(x_ref, w1t_ref, b1_ref, w2_ref, b2_ref, o_ref):
    """One batch tile, feature-major (batch-on-lanes) layout.

    x_ref  : (IN, TB)  bf16  -- streamed per grid step
    w1t_ref: (H,  IN)  bf16  -- VMEM-resident across grid steps
    b1_ref : (H,  1)   f32   -- VMEM-resident
    w2_ref : (H,  1)   f32   -- VMEM-resident
    b2_ref : (1,  1)   f32   -- SMEM scalar
    o_ref  : (1,  TB)  f32   -- lane-dense output tile
    """
    # fc1 on the MXU: (H, IN) @ (IN, TB) -> (H, TB), bf16 inputs, f32 accumulate.
    h = jnp.dot(w1t_ref[...], x_ref[...], preferred_element_type=jnp.float32)
    # bias + ReLU in f32 on the VPU.
    h = jnp.maximum(h + b1_ref[...], 0.0)
    # dropout1(p=0.5): identity at inference time (inverted dropout needs no eval scaling).
    # TODO(synk): training-mode dropout (stateful RNG mask) not implemented.
    # fc2 (64 -> 1) as VPU multiply + cross-sublane reduce; an N=1 MXU matmul
    # would use ~1/256 of the systolic array output width.
    y = jnp.sum(h * w2_ref[...], axis=0, keepdims=True) + b2_ref[0, 0]
    o_ref[...] = jax.nn.sigmoid(y)  # (1, TB) lane-dense store


def net_forward(x, w1, b1, w2, b2, *, tile_b=2048):
    """x: (B, IN) f32; w1: (IN, H); b1: (1, H) or (H,); w2: (H, 1); b2: (1, 1) or scalar.

    Returns sigmoid(relu(x @ w1 + b1) @ w2 + b2) with trailing size-1 dim dropped.
    (Note: torch's x.squeeze() would also drop a B==1 batch dim; we keep (B,).)
    """
    B, in_f = x.shape
    hidden = w1.shape[1]

    # Batch tile: multiple of 128 (lane width), capped by tile_b; batch padded to a
    # whole number of tiles. Sized well inside v7x's 32 MiB default-scoped VMEM.
    TB = _round_up(min(max(tile_b, 128), _round_up(B, 128)), 128)
    Bp = _round_up(B, TB)

    # Transposed, batch-on-lanes layout; bf16 for the MXU/HBM-bound stream.
    xT = jnp.zeros((in_f, Bp), jnp.bfloat16).at[:, :B].set(x.T.astype(jnp.bfloat16))
    w1T = w1.T.astype(jnp.bfloat16)                              # (H, IN)
    b1c = jnp.asarray(b1, jnp.float32).reshape(hidden, 1)        # (H, 1)
    w2c = jnp.asarray(w2, jnp.float32).reshape(hidden, 1)        # (H, 1)
    b2c = jnp.asarray(b2, jnp.float32).reshape(1, 1)             # (1, 1)

    out = pl.pallas_call(
        net_kernel,
        out_shape=jax.ShapeDtypeStruct((1, Bp), jnp.float32),
        grid_spec=pltpu.PrefetchScalarGridSpec(
            num_scalar_prefetch=0,
            grid=(Bp // TB,),
            in_specs=[
                pl.BlockSpec((in_f, TB), lambda i: (0, i)),        # x: streamed
                pl.BlockSpec((hidden, in_f), lambda i: (0, 0)),    # w1T: resident
                pl.BlockSpec((hidden, 1), lambda i: (0, 0)),       # b1: resident
                pl.BlockSpec((hidden, 1), lambda i: (0, 0)),       # w2: resident
                pl.BlockSpec((1, 1), lambda i: (0, 0),
                             memory_space=pltpu.MemorySpace.SMEM), # b2: SMEM scalar
            ],
            out_specs=pl.BlockSpec((1, TB), lambda i: (0, i)),
        ),
        compiler_params=pltpu.CompilerParams(
            dimension_semantics=("parallel",),
        ),
    )(xT, w1T, b1c, w2c, b2c)

    return out[0, :B]


def init_params(key, input_size=13, hidden=64):
    # Deterministic synthetic init (PyTorch-like uniform(-1/sqrt(fan_in), +)).
    k1, k2, k3, k4 = jax.random.split(key, 4)
    bound1 = 1.0 / jnp.sqrt(jnp.float32(input_size))
    bound2 = 1.0 / jnp.sqrt(jnp.float32(hidden))
    w1 = jax.random.uniform(k1, (input_size, hidden), jnp.float32, -bound1, bound1)
    b1 = jax.random.uniform(k2, (1, hidden), jnp.float32, -bound1, bound1)
    w2 = jax.random.uniform(k3, (hidden, 1), jnp.float32, -bound2, bound2)
    b2 = jax.random.uniform(k4, (1, 1), jnp.float32, -bound2, bound2)
    return w1, b1, w2, b2


def _ref_forward(x, w1, b1, w2, b2):
    h = jnp.maximum(x @ w1 + b1, 0.0)
    return jax.nn.sigmoid(h @ w2 + b2)[:, 0]


if __name__ == "__main__":
    key = jax.random.PRNGKey(0)
    kx1, kx2, kp = jax.random.split(key, 3)

    input_size, hidden = 13, 64
    w1, b1, w2, b2 = init_params(kp, input_size=input_size, hidden=hidden)

    # Test 1: tiny demo batch (single grid step, padded to one 128-lane tile).
    B1 = 8
    x1 = jax.random.normal(kx1, (B1, input_size), jnp.float32)
    out1 = net_forward(x1, w1, b1, w2, b2)
    jax.block_until_ready(out1)
    ref1 = _ref_forward(x1, w1, b1, w2, b2)
    assert out1.shape == (B1,)
    # bf16 MXU inputs -> relaxed tolerance vs. full-f32 reference.
    assert jnp.allclose(out1, ref1, atol=2e-2, rtol=0.0)

    # Test 2: exercises multi-step grid (3 tiles of 128) + batch padding.
    B2 = 300
    x2 = jax.random.normal(kx2, (B2, input_size), jnp.float32)
    out2 = net_forward(x2, w1, b1, w2, b2, tile_b=128)
    jax.block_until_ready(out2)
    ref2 = _ref_forward(x2, w1, b1, w2, b2)
    assert out2.shape == (B2,)
    assert jnp.allclose(out2, ref2, atol=2e-2, rtol=0.0)

    print("KERNEL_OK")
</pallas_src>

<mosaic_0001>
module attributes {stable_mosaic.version = 11 : i64} {
  func.func @net_kernel(%arg0: i32, %arg1: memref<13x128xbf16, #tpu.memory_space<vmem>>, %arg2: memref<64x13xbf16, #tpu.memory_space<vmem>>, %arg3: memref<64x1xf32, #tpu.memory_space<vmem>>, %arg4: memref<64x1xf32, #tpu.memory_space<vmem>>, %arg5: memref<1x1xf32, #tpu.memory_space<smem>>, %arg6: memref<1x128xf32, #tpu.memory_space<vmem>>) attributes {dimension_semantics = [#tpu.dimension_semantics<parallel>], iteration_bounds = array<i64: 1>, scalar_prefetch = 0 : i64, scratch_operands = 0 : i64, tpu.core_type = #tpu.core_type<tc>, window_params = [{transform_indices = @transform_0, window_bounds = array<i64: 13, 128>}, {pipeline_mode = #tpu.pipeline_mode<synchronous>, transform_indices = @transform_1, window_bounds = array<i64: 64, 13>}, {pipeline_mode = #tpu.pipeline_mode<synchronous>, transform_indices = @transform_2, window_bounds = array<i64: 64, 1>}, {pipeline_mode = #tpu.pipeline_mode<synchronous>, transform_indices = @transform_3, window_bounds = array<i64: 64, 1>}, {transform_indices = @transform_4, window_bounds = array<i64: 1, 1>}, {transform_indices = @transform_5, window_bounds = array<i64: 1, 128>}]} {
    %c0 = arith.constant 0 : index
    %c0_0 = arith.constant 0 : index
    %0 = vector.load %arg2[%c0, %c0_0] : memref<64x13xbf16, #tpu.memory_space<vmem>>, vector<64x13xbf16>
    %c0_1 = arith.constant 0 : index
    %c0_2 = arith.constant 0 : index
    %1 = vector.load %arg1[%c0_1, %c0_2] : memref<13x128xbf16, #tpu.memory_space<vmem>>, vector<13x128xbf16>
    %cst = arith.constant dense<0.000000e+00> : vector<64x128xf32>
    %2 = tpu.matmul %0, %1, %cst {dimension_numbers = #tpu.dot_dimension_numbers<[1], [0], [0], [1], [0, 0, 1, 1], [], []>} : vector<64x13xbf16>, vector<13x128xbf16>, vector<64x128xf32> -> vector<64x128xf32>
    %c0_3 = arith.constant 0 : index
    %c0_4 = arith.constant 0 : index
    %3 = vector.load %arg3[%c0_3, %c0_4] : memref<64x1xf32, #tpu.memory_space<vmem>>, vector<64x1xf32>
    %4 = vector.broadcast %3 : vector<64x1xf32> to vector<64x128xf32>
    %5 = arith.addf %2, %4 : vector<64x128xf32>
    %cst_5 = arith.constant 0.000000e+00 : f32
    %6 = vector.broadcast %cst_5 : f32 to vector<64x128xf32>
    %7 = arith.maximumf %5, %6 : vector<64x128xf32>
    %c0_6 = arith.constant 0 : index
    %c0_7 = arith.constant 0 : index
    %8 = vector.load %arg4[%c0_6, %c0_7] : memref<64x1xf32, #tpu.memory_space<vmem>>, vector<64x1xf32>
    %9 = vector.broadcast %8 : vector<64x1xf32> to vector<64x128xf32>
    %10 = arith.mulf %7, %9 : vector<64x128xf32>
    %cst_8 = arith.constant dense<0.000000e+00> : vector<128xf32>
    %11 = vector.multi_reduction <add>, %10, %cst_8 [0] : vector<64x128xf32> to vector<128xf32>
    %12 = vector.shape_cast %11 : vector<128xf32> to vector<1x128xf32>
    %c0_9 = arith.constant 0 : index
    %c0_10 = arith.constant 0 : index
    %13 = memref.load %arg5[%c0_9, %c0_10] : memref<1x1xf32, #tpu.memory_space<smem>>
    %14 = vector.broadcast %13 : f32 to vector<1x128xf32>
    %15 = arith.addf %12, %14 : vector<1x128xf32>
    %16 = arith.negf %15 : vector<1x128xf32>
    %17 = math.exp %16 : vector<1x128xf32>
    %cst_11 = arith.constant 1.000000e+00 : f32
    %18 = vector.broadcast %cst_11 : f32 to vector<1x128xf32>
    %19 = arith.addf %18, %17 : vector<1x128xf32>
    %20 = arith.divf %18, %19 : vector<1x128xf32>
    %c0_12 = arith.constant 0 : index
    %c0_13 = arith.constant 0 : index
    %21 = vector.load %arg6[%c0_12, %c0_13] : memref<1x128xf32, #tpu.memory_space<vmem>>, vector<1x128xf32>
    tpu.vector_store %arg6[%c0_12, %c0_13], %20 {strides = array<i32>} : memref<1x128xf32, #tpu.memory_space<vmem>>, vector<1x128xf32>,
    return
  }
  func.func @transform_0(%arg0: i32) -> (i32, i32) {
    %c0_i32 = arith.constant 0 : i32
    %c0_i32_0 = arith.constant 0 : i32
    return %c0_i32, %arg0 : i32, i32
  }
  func.func @transform_1(%arg0: i32) -> (i32, i32) {
    %c0_i32 = arith.constant 0 : i32
    %c0_i32_0 = arith.constant 0 : i32
    %c0_i32_1 = arith.constant 0 : i32
    return %c0_i32, %c0_i32_0 : i32, i32
  }
  func.func @transform_2(%arg0: i32) -> (i32, i32) {
    %c0_i32 = arith.constant 0 : i32
    %c0_i32_0 = arith.constant 0 : i32
    %c0_i32_1 = arith.constant 0 : i32
    return %c0_i32, %c0_i32_0 : i32, i32
  }
  func.func @transform_3(%arg0: i32) -> (i32, i32) {
    %c0_i32 = arith.constant 0 : i32
    %c0_i32_0 = arith.constant 0 : i32
    %c0_i32_1 = arith.constant 0 : i32
    return %c0_i32, %c0_i32_0 : i32, i32
  }
  func.func @transform_4(%arg0: i32) -> (i32, i32) {
    %c0_i32 = arith.constant 0 : i32
    %c0_i32_0 = arith.constant 0 : i32
    %c0_i32_1 = arith.constant 0 : i32
    return %c0_i32, %c0_i32_0 : i32, i32
  }
  func.func @transform_5(%arg0: i32) -> (i32, i32) {
    %c0_i32 = arith.constant 0 : i32
    %c0_i32_0 = arith.constant 0 : i32
    return %c0_i32, %arg0 : i32, i32
  }
}

</mosaic_0001>

<bundles_post_ra>
// kernel: tpu_custom_call.1
= control target key start
LH: loop header
LB: loop body
LE: loop exit
PB: predicated region body
PF: predicated region fallthrough
CT: control target
= control target key end

     0   :  { %vm119_vm0 = vcmask 1045504   ;;  %vm120_vm1 = vcmask 1046528   ;;  %v340_v3 = vmov 0   ;;  %v341_v7 = vmov 65535   ;;  %s445_s0 = inlined_call_operand.vmem [shape: bf16[13,128], index: 0, kind: input, shape index: {}]   ;;  %s446_s1 = inlined_call_operand.vmem [shape: bf16[64,13], index: 1, kind: input, shape index: {}]   ;;  %s447_s2 = inlined_call_operand.vmem [shape: f32[64,1], index: 2, kind: input, shape index: {}]   ;;  %s448_s3 = inlined_call_operand.vmem [shape: f32[64,1], index: 3, kind: input, shape index: {}]   ;;  %s449_s4 = inlined_call_operand.<no memory space> [shape: f32[1,1], index: 4, kind: input, shape index: {}]   ;;  %s450_s5 = inlined_call_operand.hbm [shape: f32[1,128], index: 5, kind: output, shape index: {}]  }
   0x1   :  { %v163_v0 = vld [vmem:[%s448_s3] sm:$0xff]  ;;  %v35_v1 = vld [vmem:[%s447_s2 + $0x10] sm:$0xff]  ;;  %309 = vset.pattern.permute.xlu2 %v340_v3  ;;  %308 = vset.pattern.permute.xlu1 %v340_v3  ;;  %v121_v8 = vsel %vm119_vm0, 4294967295, %v341_v7  ;;  %v297_v12 = vld [vmem:[%s446_s1 + $0x8] sm:$0xff]  ;;  %vm106_vm2 = vcmask 105472  }
   0x2   :  { %v33_v2 = vld [vmem:[%s447_s2] sm:$0xff]  ;;  %307 = vset.pattern.permute.xlu0 %v340_v3  ;;  %173 = vperm.xlu2 %309, %v163_v0   ;;  %v122_v9 = vsel %vm120_vm1, %v121_v8, 0  ;;  %v298_v13 = vld [vmem:[%s446_s1 + $0x10] sm:$0xff]  ;;  %v299_v14 = vld [vmem:[%s446_s1 + $0x18] sm:$0xff] }
   0x3   :  { %v289_v4 = vld [vmem:[%s445_s0] sm:$0xf]  ;;  %v300_v5 = vld [vmem:[%s445_s0] sm:$0x70]  ;;  %53 = vperm.xlu1 %308, %v35_v1   ;;  %43 = vperm.xlu0 %307, %v33_v2  }
   0x4   :  { %v290_v6 = vor.u32 %v300_v5, %v289_v4  ;;  %v296_v11 = vld [vmem:[%s446_s1] sm:$0xff] }
   0x6   :  { %v124_v10 = vand.u32 %v290_v6, %v122_v9 }
   0x8   :  { %133 = vmatpush.bf16.msra.mxu0 %v124_v10  ;;  %301 = vmatpush.bf16.msra.mxu1 %v124_v10 }
   0x9   :  { %302 = vmatpush.bf16.msra.mxu2 %v124_v10  ;;  %303 = vmatpush.bf16.msra.mxu3 %v124_v10 }
   0xa   :  { %11 = vsyncpa [#allocation4], 0  ;;  %v164_v15 = vld [vmem:[%s448_s3 + $0x8] sm:$0xff]  ;;  %v36_v16 = vld [vmem:[%s447_s2 + $0x18] sm:$0xff]  ;;  %s342_s9 = smov [#allocation3]  }
   0xb   :  { %291 = vmatmul.msk.bf16.vlgmr.msra.gmra.mxu0 %vm106_vm2, %v296_v11  ;;  %292 = vmatmul.msk.bf16.vlgmr.msra.gmra.mxu1 %vm106_vm2, %v297_v12  ;;  %v34_v17 = vld [vmem:[%s447_s2 + $0x8] sm:$0xff]  ;;  %v165_v19 = vld [vmem:[%s448_s3 + $0x10] sm:$0xff]  ;;  %v37_v20 = vld [vmem:[%s447_s2 + $0x20] sm:$0xff]  ;;  %s260_s10 = sshll.u32 %s342_s9, 4  ;;  %s261_s10 = int_to_ptr.vmem [resolvable:$true] %s260_s10 }
   0xc   :  { %293 = vmatmul.msk.bf16.vlgmr.msra.gmra.mxu2 %vm106_vm2, %v298_v13  ;;  %294 = vmatmul.msk.bf16.vlgmr.msra.gmra.mxu3 %vm106_vm2, %v299_v14  ;;  %v38_v18 = vld [vmem:[%s447_s2 + $0x28] sm:$0xff]  ;;  %v167_v21 = vld [vmem:[%s448_s3 + $0x20] sm:$0xff]  ;;  %v39_v22 = vld [vmem:[%s447_s2 + $0x30] sm:$0xff] }
   0xd   :  { %178 = vperm.xlu2 %309, %v164_v15   ;;  %58 = vperm.xlu1 %308, %v36_v16   ;;  %v166_v23 = vld [vmem:[%s448_s3 + $0x18] sm:$0xff]  ;;  %v169_v24 = vld [vmem:[%s448_s3 + $0x30] sm:$0xff]  ;;  %v168_v25 = vld [vmem:[%s448_s3 + $0x28] sm:$0xff] }
   0xe   :  { %48 = vperm.xlu0 %307, %v34_v17   ;;  %v40_v26 = vld [vmem:[%s447_s2 + $0x38] sm:$0xff] }
   0xf   :  { %v170_v27 = vld [vmem:[%s448_s3 + $0x38] sm:$0xff] }
  0x15   :  { %68 = vperm.xlu2 %309, %v38_v18   ;;  %183 = vperm.xlu1 %308, %v165_v19  }
  0x16   :  { %63 = vperm.xlu0 %307, %v37_v20  }
  0x1d   :  { %193 = vperm.xlu2 %309, %v167_v21   ;;  %73 = vperm.xlu1 %308, %v39_v22  }
  0x1e   :  { %188 = vperm.xlu0 %307, %v166_v23  }
  0x25   :  { %203 = vperm.xlu2 %309, %v169_v24   ;;  %198 = vperm.xlu1 %308, %v168_v25   ;;  %v233_v24 = vstv %s449_s4  ;;  %s262_s4 = sshll.u32 %s450_s5, 4  ;;  %s263_s4 = int_to_ptr.hbm [resolvable:$true] %s262_s4 }
  0x26   :  { %78 = vperm.xlu0 %307, %v40_v26  }
  0x2e   :  { %208 = vperm.xlu0 %307, %v170_v27  }
  0x5c   :  { %v174_v28 = vpop.permute.xlu2 %173 }
  0x67   :  { %v179_v33 = vpop.permute.xlu2 %178 }
  0x6f   :  { %v69_v38 = vpop.permute.xlu2 %68 }
  0x75   :  { %v54_v29 = vpop.permute.xlu1 %53  ;;  %v44_v30 = vpop.permute.xlu0 %43 }
  0x77   :  { %v194_v53 = vpop.permute.xlu2 %193 }
  0x7f   :  { %v59_v31 = vpop.permute.xlu1 %58  ;;  %v204_v11 = vpop.permute.xlu2 %203 }
  0x80   :  { %v49_v32 = vpop.permute.xlu0 %48 }
  0x87   :  { %v184_v36 = vpop.permute.xlu1 %183 }
  0x88   :  { %v64_v34 = vpop.permute.xlu0 %63  ;;  %v135_v35 = vpop.f32.mrf.mxu0 }
  0x89   :  { %v140_v37 = vpop.f32.mrf.mxu1  ;;  %v136_v39 = vadd.f32 %v135_v35, %v44_v30 }
  0x8a   :  { %v141_v40 = vadd.f32 %v140_v37, %v54_v29 }
  0x8b   :  { %v155_v46 = vmax.f32 %v136_v39, 0.0 }
  0x8c   :  { %v157_v49 = vmax.f32 %v141_v40, 0.0 }
  0x8d   :  { %v211_v54 = vmul.f32 %v174_v28, %v155_v46 }
  0x8e   :  { %v213_v57 = vmul.f32 %v184_v36, %v157_v49 }
  0x8f   :  { %v145_v41 = vpop.f32.mrf.mxu2  ;;  %v150_v42 = vpop.f32.mrf.mxu3 }
  0x90   :  { %v189_v43 = vpop.permute.xlu0 %188  ;;  %v137_v44 = vpop.f32.mrf.mxu0  ;;  %v146_v51 = vadd.f32 %v145_v41, %v64_v34 }
  0x91   :  { %v142_v45 = vpop.f32.mrf.mxu1  ;;  %v138_v47 = vadd.f32 %v137_v44, %v49_v32  ;;  %v74_v50 = vpop.permute.xlu1 %73 }
  0x92   :  { %v143_v48 = vadd.f32 %v142_v45, %v59_v31  ;;  %v159_v59 = vmax.f32 %v146_v51, 0.0  ;;  %v151_v60 = vadd.f32 %v150_v42, %v74_v50 }
  0x93   :  { %v156_v52 = vmax.f32 %v138_v47, 0.0 }
  0x94   :  { %v158_v56 = vmax.f32 %v143_v48, 0.0  ;;  %v215_v5 = vmul.f32 %v194_v53, %v159_v59  ;;  %v161_v6 = vmax.f32 %v151_v60, 0.0 }
  0x95   :  { %v212_v55 = vmul.f32 %v179_v33, %v156_v52 }
  0x96   :  { %v214_v1 = vmul.f32 %v189_v43, %v158_v56  ;;  %v217_v13 = vmul.f32 %v204_v11, %v161_v6 }
  0x97   :  { %v147_v58 = vpop.f32.mrf.mxu2  ;;  %v219_v61 = vadd.f32 %v212_v55, %v211_v54  ;;  %v152_v63 = vpop.f32.mrf.mxu3 }
  0x98   :  { %v148_v62 = vadd.f32 %v147_v58, %v69_v38  ;;  %v79_v0 = vpop.permute.xlu0 %78 }
  0x99   :  { %v220_v2 = vadd.f32 %v219_v61, %v213_v57  ;;  %v153_v4 = vadd.f32 %v152_v63, %v79_v0  ;;  %v199_v8 = vpop.permute.xlu1 %198 }
  0x9a   :  { %v160_v3 = vmax.f32 %v148_v62, 0.0 }
  0x9b   :  { %v221_v7 = vadd.f32 %v220_v2, %v214_v1  ;;  %v162_v12 = vmax.f32 %v153_v4, 0.0 }
  0x9c   :  { %v216_v9 = vmul.f32 %v199_v8, %v160_v3 }
  0x9d   :  { %v222_v10 = vadd.f32 %v221_v7, %v215_v5 }
  0x9f   :  { %v223_v14 = vadd.f32 %v222_v10, %v216_v9 }
  0xa0   :  { %v209_v15 = vpop.permute.xlu0 %208 }
  0xa1   :  { %v218_v16 = vmul.f32 %v209_v15, %v162_v12  ;;  %v224_v17 = vadd.f32 %v223_v14, %v217_v13 }
  0xa3   :  { %v225_v18 = vadd.f32 %v224_v17, %v218_v16 }
  0xa5   :  { %v226_v19 = vrot.slane %v225_v18, 4 }
  0xa7   :  { %v227_v20 = vadd.f32 %v226_v19, %v225_v18 }
  0xa9   :  { %v228_v21 = vrot.slane %v227_v20, 2 }
  0xab   :  { %v229_v22 = vadd.f32 %v228_v21, %v227_v20 }
  0xad   :  { %v230_v23 = vrot.slane %v229_v22, 1 }
  0xaf   :  { %v231_v25 = vadd.f32 %v230_v23, %v229_v22 }
  0xb1   :  { %v234_v26 = vadd.f32 %v233_v24, %v231_v25 }
  0xb3   :  { %v295_v27 = vmul.f32 -1.442695, %v234_v26 }
  0xb5   :  { %310 = vpow2.f32 %v295_v27 }
  0xbb   :  { %v311_v28 = vpop.eup %310 }
  0xbc   :  { %v238_v29 = vadd.f32 1.0, %v311_v28 }
  0xbe   :  { %312 = vrcp.f32 %v238_v29  ;;  %v250_v33 = vand.u32 2147483648, %v238_v29  ;;  %v248_v35 = vand.u32 2147483647, %v238_v29  ;;  %vm244_vm4 = vweird.f32 %v238_v29 }
  0xc0   :  { %v251_v37 = vor.u32 1.1754944e-38, %v250_v33  ;;  %vm249_vm6 = vcmp.eq.f32.partialorder %v248_v35, 8.507059e+37 }
  0xc4   :  { %v313_v30 = vpop.eup %312 }
  0xc5   :  { %v240_v31 = vmul.f32 %v313_v30, %v238_v29  ;;  %vm245_vm3 = vweird.f32 %v313_v30 }
  0xc6   :  { %vm246_vm5 = vmor %vm244_vm4, %vm245_vm3 }
  0xc7   :  { %v241_v32 = vsub.f32 1.0, %v240_v31 }
  0xc9   :  { %v242_v34 = vmul.f32 %v313_v30, %v241_v32 }
  0xcb   :  { %v243_v36 = vadd.f32 %v313_v30, %v242_v34 }
  0xcd   :  { %v247_v38 = vsel %vm246_vm5, %v313_v30, %v243_v36 }
  0xce   :  { %v252_v39 = vsel %vm249_vm6, %v251_v37, %v247_v38 }
  0xcf   :  { %254 = vst [vmem:[#allocation3] sm:$0x1] %v252_v39 }
  0xd0   :  { %265 = dma.vmem_to_hbm [thread:$0]  %s261_s10, 16, %s263_s4, [#allocation4]  }
  0xd1   :  { %338 = dma.done.wait [#allocation4], 16  }
  0xd2   :  { %339 = vsyncadd [#allocation4], 4294967280 }
  0xd3   :  { %270 = vsyncpa [#allocation4], 1 }

</bundles_post_ra>
